<compile_context>
chip_gen: v7x
topology: tpu7x:2x2x1
jax: 0.10.0
libtpu: 0.0.40
codegen_flags: <defaults>
</compile_context>

<pallas_src>
import numpy as np
import jax
import jax.numpy as jnp
from jax.experimental import pallas as pl
from jax.experimental.pallas import tpu as pltpu

KSIZE = 5
PAD = 4            # F.conv2d padding=4
HALF = KSIZE // 2  # 2


def gaussian_2d_kernel(kernel_size=5, sigma=1):
    kernel = np.zeros([kernel_size, kernel_size])
    center = kernel_size // 2
    if sigma == 0:
        sigma = ((kernel_size - 1) * 0.5 - 1) * 0.3 + 0.8
    s = 2 * sigma ** 2
    sum_val = 0.0
    for i in range(kernel_size):
        for j in range(kernel_size):
            x = i - center
            y = j - center
            kernel[i, j] = np.exp(-(x ** 2 + y ** 2) / s)
            sum_val += kernel[i, j]
    return kernel * (1.0 / sum_val)


# 1-D separable taps: outer(_G1D, _G1D) == normalized 5x5 Gaussian (up to fp rounding).
_e = np.exp(-((np.arange(KSIZE) - KSIZE // 2) ** 2) / 2.0)
_G1D = (_e / _e.sum()).astype(np.float32)
_GWEIGHT = gaussian_2d_kernel(KSIZE, 1).astype(np.float32)  # reference check only


def _round_up(v, m):
    return -(-v // m) * m


def _make_gauss_kernel(h, w, hb, wp, h_out, w_out):
    g0, g1, g2 = float(_G1D[0]), float(_G1D[1]), float(_G1D[2])

    def kernel(x_ref, o_ref, xb_ref):
        # x_ref:  (1, 1, H, W)        one channel plane
        # o_ref:  (1, 1, H+4, W+4)    exact-width output block
        # xb_ref: (hb, wp)            zero-bordered plane, (8,128)-aligned VMEM scratch

        # Border-only zeroing (scratch is per-core and not zero-initialized, so this
        # runs every grid step; the interior below is written exactly once).
        xb_ref[0:HALF, :] = jnp.zeros((HALF, wp), jnp.float32)
        xb_ref[h + HALF:, :] = jnp.zeros((hb - h - HALF, wp), jnp.float32)
        xb_ref[:, 0:HALF] = jnp.zeros((hb, HALF), jnp.float32)
        xb_ref[:, w + HALF:] = jnp.zeros((hb, wp - w - HALF), jnp.float32)
        # Channel plane placed at a (2, 2) offset -> symmetric +-1/+-2 taps below.
        xb_ref[HALF:h + HALF, HALF:w + HALF] = x_ref[0, 0]

        xv = xb_ref[...]

        # Horizontal (lane-axis) 5-tap pass via XLU rotates. Each +-s pair is
        # identical under either rotate sign convention; wrap-around only lands
        # in the zero border (>= 2 zero lanes at each edge).
        acc = g2 * xv
        acc = acc + g1 * (pltpu.roll(xv, 1, axis=1) + pltpu.roll(xv, wp - 1, axis=1))
        acc = acc + g0 * (pltpu.roll(xv, 2, axis=1) + pltpu.roll(xv, wp - 2, axis=1))

        # Vertical (sublane-axis) 5-tap pass; the first-pass result stays in vregs
        # (no intermediate VMEM store/reload). Rows outside the plane are zero, so
        # wrap-around again only picks up zeros.
        out = g2 * acc
        out = out + g1 * (pltpu.roll(acc, 1, axis=0) + pltpu.roll(acc, hb - 1, axis=0))
        out = out + g0 * (pltpu.roll(acc, 2, axis=0) + pltpu.roll(acc, hb - 2, axis=0))

        o_ref[0, 0] = out[:h_out, :w_out]

    return kernel


def gaussian_conv(x):
    """x: (N, C, H, W), C >= 3. Returns (N, 3, H+4, W+4) float32."""
    n, c, h, w = x.shape
    assert c >= 3, "Gaussian_Conv uses channels 0, 1, 2"
    x = x.astype(jnp.float32)

    h_out = h + 2 * PAD - KSIZE + 1          # H + 4
    w_out = w + 2 * PAD - KSIZE + 1          # W + 4
    hb = _round_up(h_out, 8)                 # sublane-aligned scratch height (>= H+4)
    wp = _round_up(w_out, 128)               # lane-aligned scratch width    (>= W+4)

    # VMEM budget with (8,128)-rounded physical tile sizes; in/out blocks are
    # double-buffered by the pipeline, the scratch is single-buffered, plus an
    # allowance for the in-vreg/spilled intermediates of the two passes.
    plane = hb * wp * 4
    in_block = _round_up(h, 8) * _round_up(w, 128) * 4
    out_block = plane
    budget = 2 * (in_block + out_block) + plane + 4 * plane
    try:
        vmem_cap = int(pltpu.get_tpu_info().vmem_capacity_bytes)
    except Exception:
        vmem_cap = 64 * 2 ** 20
    vmem_limit = int(min(max(int(1.25 * budget), 16 * 2 ** 20), (3 * vmem_cap) // 4))
    # TODO(synk): halo-aware row tiling (grid=(n, 3, row_tiles)) for very large planes
    # whose full-plane working set would spill on v7x's 64 MiB VMEM.
    # TODO(synk): optional MXU Toeplitz band-matmul for the lane pass (v6e/v7x, large W).

    return pl.pallas_call(
        _make_gauss_kernel(h, w, hb, wp, h_out, w_out),
        out_shape=jax.ShapeDtypeStruct((n, 3, h_out, w_out), jnp.float32),
        grid_spec=pltpu.PrefetchScalarGridSpec(
            num_scalar_prefetch=0,
            grid=(n, 3),
            in_specs=[pl.BlockSpec((1, 1, h, w), lambda b, ch: (b, ch, 0, 0))],
            out_specs=pl.BlockSpec((1, 1, h_out, w_out), lambda b, ch: (b, ch, 0, 0)),
            scratch_shapes=[pltpu.VMEM((hb, wp), jnp.float32)],
        ),
        compiler_params=pltpu.CompilerParams(
            dimension_semantics=("parallel", "parallel"),
            vmem_limit_bytes=vmem_limit),
    )(x)


def _reference(x):
    """Pure-JAX reference (lax conv) matching F.conv2d(padding=4)."""
    x3 = x[:, :3].astype(jnp.float32)
    n, _, h, w = x3.shape
    w4 = jnp.asarray(_GWEIGHT, dtype=jnp.float32).reshape(1, 1, KSIZE, KSIZE)
    planes = x3.reshape(n * 3, 1, h, w)
    out = jax.lax.conv_general_dilated(
        planes, w4, window_strides=(1, 1),
        padding=((PAD, PAD), (PAD, PAD)),
        dimension_numbers=("NCHW", "OIHW", "NCHW"))
    return out.reshape(n, 3, h + 2 * PAD - KSIZE + 1, w + 2 * PAD - KSIZE + 1)


if __name__ == "__main__":
    key = jax.random.PRNGKey(0)
    x = jax.random.normal(key, (2, 4, 16, 16), dtype=jnp.float32)

    out = gaussian_conv(x)
    jax.block_until_ready(out)

    ref = _reference(x)
    assert out.shape == (2, 3, 20, 20), out.shape
    np.testing.assert_allclose(np.asarray(out), np.asarray(ref),
                               rtol=1e-5, atol=1e-5)
    print("KERNEL_OK")
</pallas_src>

<mosaic_0001>
module attributes {stable_mosaic.version = 11 : i64} {
  func.func @kernel(%arg0: i32, %arg1: i32, %arg2: memref<1x1x16x16xf32, #tpu.memory_space<vmem>>, %arg3: memref<1x1x20x20xf32, #tpu.memory_space<vmem>>, %arg4: memref<24x128xf32, #tpu.memory_space<vmem>>) attributes {dimension_semantics = [#tpu.dimension_semantics<parallel>, #tpu.dimension_semantics<parallel>], iteration_bounds = array<i64: 2, 3>, scalar_prefetch = 0 : i64, scratch_operands = 1 : i64, tpu.core_type = #tpu.core_type<tc>, window_params = [{transform_indices = @transform_0, window_bounds = array<i64: 1, 1, 16, 16>}, {transform_indices = @transform_1, window_bounds = array<i64: 1, 1, 20, 20>}]} {
    %cst = arith.constant 0.000000e+00 : f32
    %0 = vector.broadcast %cst : f32 to vector<2x128xf32>
    %c0 = arith.constant 0 : index
    %c0_0 = arith.constant 0 : index
    %1 = vector.load %arg4[%c0, %c0_0] : memref<24x128xf32, #tpu.memory_space<vmem>>, vector<2x128xf32>
    tpu.vector_store %arg4[%c0, %c0_0], %0 {strides = array<i32>} : memref<24x128xf32, #tpu.memory_space<vmem>>, vector<2x128xf32>,
    %cst_1 = arith.constant 0.000000e+00 : f32
    %2 = vector.broadcast %cst_1 : f32 to vector<6x128xf32>
    %c18 = arith.constant 18 : index
    %c0_2 = arith.constant 0 : index
    %3 = vector.load %arg4[%c18, %c0_2] : memref<24x128xf32, #tpu.memory_space<vmem>>, vector<6x128xf32>
    tpu.vector_store %arg4[%c18, %c0_2], %2 {strides = array<i32>} : memref<24x128xf32, #tpu.memory_space<vmem>>, vector<6x128xf32>,
    %cst_3 = arith.constant 0.000000e+00 : f32
    %4 = vector.broadcast %cst_3 : f32 to vector<24x2xf32>
    %c0_4 = arith.constant 0 : index
    %c0_5 = arith.constant 0 : index
    %5 = vector.load %arg4[%c0_4, %c0_5] : memref<24x128xf32, #tpu.memory_space<vmem>>, vector<24x2xf32>
    tpu.vector_store %arg4[%c0_4, %c0_5], %4 {strides = array<i32>} : memref<24x128xf32, #tpu.memory_space<vmem>>, vector<24x2xf32>,
    %cst_6 = arith.constant 0.000000e+00 : f32
    %6 = vector.broadcast %cst_6 : f32 to vector<24x110xf32>
    %c0_7 = arith.constant 0 : index
    %c18_8 = arith.constant 18 : index
    %7 = vector.load %arg4[%c0_7, %c18_8] : memref<24x128xf32, #tpu.memory_space<vmem>>, vector<24x110xf32>
    tpu.vector_store %arg4[%c0_7, %c18_8], %6 {strides = array<i32>} : memref<24x128xf32, #tpu.memory_space<vmem>>, vector<24x110xf32>,
    %c0_9 = arith.constant 0 : index
    %c0_10 = arith.constant 0 : index
    %c0_11 = arith.constant 0 : index
    %c0_12 = arith.constant 0 : index
    %8 = vector.load %arg2[%c0_9, %c0_10, %c0_11, %c0_12] : memref<1x1x16x16xf32, #tpu.memory_space<vmem>>, vector<1x1x16x16xf32>
    %9 = vector.shape_cast %8 : vector<1x1x16x16xf32> to vector<16x16xf32>
    %c2 = arith.constant 2 : index
    %c2_13 = arith.constant 2 : index
    %10 = vector.load %arg4[%c2, %c2_13] : memref<24x128xf32, #tpu.memory_space<vmem>>, vector<16x16xf32>
    tpu.vector_store %arg4[%c2, %c2_13], %9 {strides = array<i32>} : memref<24x128xf32, #tpu.memory_space<vmem>>, vector<16x16xf32>,
    %c0_14 = arith.constant 0 : index
    %c0_15 = arith.constant 0 : index
    %11 = vector.load %arg4[%c0_14, %c0_15] : memref<24x128xf32, #tpu.memory_space<vmem>>, vector<24x128xf32>
    %cst_16 = arith.constant 0.402619958 : f32
    %12 = vector.broadcast %cst_16 : f32 to vector<24x128xf32>
    %13 = arith.mulf %12, %11 : vector<24x128xf32>
    %c1_i32 = arith.constant 1 : i32
    %14 = tpu.dynamic_rotate %11 by %c1_i32 dim 1 : vector<24x128xf32>, i32 -> vector<24x128xf32>
    %c127_i32 = arith.constant 127 : i32
    %15 = tpu.dynamic_rotate %11 by %c127_i32 dim 1 : vector<24x128xf32>, i32 -> vector<24x128xf32>
    %16 = arith.addf %14, %15 : vector<24x128xf32>
    %cst_17 = arith.constant 0.244201347 : f32
    %17 = vector.broadcast %cst_17 : f32 to vector<24x128xf32>
    %18 = arith.mulf %17, %16 : vector<24x128xf32>
    %19 = arith.addf %13, %18 : vector<24x128xf32>
    %c2_i32 = arith.constant 2 : i32
    %20 = tpu.dynamic_rotate %11 by %c2_i32 dim 1 : vector<24x128xf32>, i32 -> vector<24x128xf32>
    %c126_i32 = arith.constant 126 : i32
    %21 = tpu.dynamic_rotate %11 by %c126_i32 dim 1 : vector<24x128xf32>, i32 -> vector<24x128xf32>
    %22 = arith.addf %20, %21 : vector<24x128xf32>
    %cst_18 = arith.constant 0.054488685 : f32
    %23 = vector.broadcast %cst_18 : f32 to vector<24x128xf32>
    %24 = arith.mulf %23, %22 : vector<24x128xf32>
    %25 = arith.addf %19, %24 : vector<24x128xf32>
    %cst_19 = arith.constant 0.402619958 : f32
    %26 = vector.broadcast %cst_19 : f32 to vector<24x128xf32>
    %27 = arith.mulf %26, %25 : vector<24x128xf32>
    %c1_i32_20 = arith.constant 1 : i32
    %28 = tpu.dynamic_rotate %25 by %c1_i32_20 dim 0 : vector<24x128xf32>, i32 -> vector<24x128xf32>
    %c23_i32 = arith.constant 23 : i32
    %29 = tpu.dynamic_rotate %25 by %c23_i32 dim 0 : vector<24x128xf32>, i32 -> vector<24x128xf32>
    %30 = arith.addf %28, %29 : vector<24x128xf32>
    %cst_21 = arith.constant 0.244201347 : f32
    %31 = vector.broadcast %cst_21 : f32 to vector<24x128xf32>
    %32 = arith.mulf %31, %30 : vector<24x128xf32>
    %33 = arith.addf %27, %32 : vector<24x128xf32>
    %c2_i32_22 = arith.constant 2 : i32
    %34 = tpu.dynamic_rotate %25 by %c2_i32_22 dim 0 : vector<24x128xf32>, i32 -> vector<24x128xf32>
    %c22_i32 = arith.constant 22 : i32
    %35 = tpu.dynamic_rotate %25 by %c22_i32 dim 0 : vector<24x128xf32>, i32 -> vector<24x128xf32>
    %36 = arith.addf %34, %35 : vector<24x128xf32>
    %cst_23 = arith.constant 0.054488685 : f32
    %37 = vector.broadcast %cst_23 : f32 to vector<24x128xf32>
    %38 = arith.mulf %37, %36 : vector<24x128xf32>
    %39 = arith.addf %33, %38 : vector<24x128xf32>
    %40 = vector.extract_strided_slice %39 {offsets = [0, 0], sizes = [20, 20], strides = [1, 1]} : vector<24x128xf32> to vector<20x20xf32>
    %c0_24 = arith.constant 0 : index
    %c0_25 = arith.constant 0 : index
    %c0_26 = arith.constant 0 : index
    %c0_27 = arith.constant 0 : index
    %41 = vector.load %arg3[%c0_24, %c0_25, %c0_26, %c0_27] : memref<1x1x20x20xf32, #tpu.memory_space<vmem>>, vector<1x1x20x20xf32>
    %42 = vector.shape_cast %41 : vector<1x1x20x20xf32> to vector<20x20xf32>
    %43 = vector.shape_cast %40 : vector<20x20xf32> to vector<1x1x20x20xf32>
    tpu.vector_store %arg3[%c0_24, %c0_25, %c0_26, %c0_27], %43 {strides = array<i32>} : memref<1x1x20x20xf32, #tpu.memory_space<vmem>>, vector<1x1x20x20xf32>,
    return
  }
  func.func @transform_0(%arg0: i32, %arg1: i32) -> (i32, i32, i32, i32) {
    %c0_i32 = arith.constant 0 : i32
    %c0_i32_0 = arith.constant 0 : i32
    %c0_i32_1 = arith.constant 0 : i32
    return %arg0, %arg1, %c0_i32, %c0_i32_0 : i32, i32, i32, i32
  }
  func.func @transform_1(%arg0: i32, %arg1: i32) -> (i32, i32, i32, i32) {
    %c0_i32 = arith.constant 0 : i32
    %c0_i32_0 = arith.constant 0 : i32
    %c0_i32_1 = arith.constant 0 : i32
    return %arg0, %arg1, %c0_i32, %c0_i32_0 : i32, i32, i32, i32
  }
}

</mosaic_0001>

<bundles_post_ra>
// kernel: tpu_custom_call.1
= control target key start
LH: loop header
LB: loop body
LE: loop exit
PB: predicated region body
PF: predicated region fallthrough
CT: control target
= control target key end

     0   :  { %6 = vsyncpa [#allocation4], 0  ;;  %s770_s0 = inlined_call_operand.hbm [shape: f32[2,4,16,16], index: 0, kind: input, shape index: {}]   ;;  %s771_s1 = inlined_call_operand.vmem [shape: f32[2,3,20,20], index: 1, kind: output, shape index: {}]  }
   0x1   :  { %8 = vsyncpa [#allocation4 + $0x1], 0  ;;  %s600_s6 = smov 0   ;;  %s602_s7 = smov 0  }
   0x2   :  { %s604_s8 = smov 0   ;;  %s606_s9 = smov 0  }
   0x3   :  { %s608_s10 = smov 0   ;;  %s610_s11 = smov 0  }
   0x4   :  { %s612_s12 = smov 0   ;;  %s614_s13 = smov 0  }
   0x5 LB: > { %s391_s14 = sadd.s32 4294967295, %s580_s13   ;;  %s23_s15 = sadd.s32 1, %s572_s11  ;;  %s580_s13 = sphi %s614_s13, %s14_s13   ;;  %s576_s12 = sphi %s612_s12, %s782_s12   ;;  %s572_s11 = sphi %s610_s11, %s781_s11   ;;  %s568_s10 = sphi %s608_s10, %s780_s10   ;;  %s564_s9 = sphi %s606_s9, %s779_s9   ;;  %s560_s8 = sphi %s604_s8, %s778_s8   ;;  %s556_s7 = sphi %s602_s7, %s777_s7   ;;  %s552_s6 = sphi %s600_s6, %s776_s6  }
   0x6   : > { %p24_p0 = scmp.ge.s32.totalorder %s23_s15, 3  ;;  %s26_s16 = sadd.s32 1, %s576_s12 }
   0x7   : > { %s35_s17 = sadd.s32 1, %s560_s8  ;;  %p42_p1 = scmp.ne.s32.totalorder %s560_s8, %s556_s7 }
   0x8   : > { %s784_s15 = smov (%p24_p0, %s23_s15), 0  ;;  %s786_s16 = smov (!%p24_p0, %s26_s16), %s576_s12 }
   0x9   : > { %s31_s18 = ssub.s32 %s572_s11, %s784_s15  ;;  %p43_p2 = scmp.eq.s32.totalorder %s580_s13, 0 }
   0xa   : > { %p28_p3 = scmp.ge.s32.totalorder %s786_s16, 2  ;;  %p48_p4 = scmp.ne.s32.totalorder %s556_s7, %s552_s6 }
   0xb   : > { %p651_p5 = por %p43_p2, %p42_p1  ;;  %p49_p6 = scmp.eq.s32.totalorder %s391_s14, 0 }
   0xc   : > { %s788_s16 = smov (%p28_p3, %s786_s16), 0  ;;  %p412_p8 = scmp.lt.s32.totalorder %s580_s13, 6 }
   0xd   : > { %p657_p7 = por %p49_p6, %p48_p4  ;;  %s30_s21 = ssub.s32 %s576_s12, %s788_s16 }
   0xe   : > { %s32_s22 = sor.u32 %s31_s18, %s30_s21  ;;  %s100_s23 = sand.u32 1, %s560_s8  }
   0xf   : > { %p33_p9 = scmp.eq.s32.totalorder %s32_s22, 0  ;;  %s395_s24 = sshll.u32 %s100_s23, 4 }
  0x10   : > { %s396_s25 = sshll.u32 %s572_s11, 1  ;;  %s397_s27 = sshll.u32 %s576_s12, 3 }
  0x11   : > { %s667_s26 = scalar_select %p33_p9, %s560_s8, %s35_s17  }
  0x12   : > { %s110_s28 = sadd.s32 %s397_s27, %s396_s25  ;;  %s104_s29 = scalar_lea.vmem [#allocation3], %s395_s24 }
  0x13   : > { %s113_s30 = sshll.u32 %s104_s29, 4  ;;  %s398_s2 = sshll.u32 %s110_s28, 7  ;;  %s670_s30 = int_to_ptr.vmem [resolvable:$true] %s113_s30 }
  0x14   : > { %s675_s5 = scalar_lea.hbm %s770_s0, %s398_s2  ;;  %p681_p10 = pnand %p412_p8, %p651_p5 }
  0x15   : > { %s686_s14 = scalar_lea.sflag [#allocation4], %s100_s23  ;;  %s484_s17 = scalar_lea.hbm %s675_s5, 256 }
  0x16   : > { %p485_p12 = scmp.ne.s32.totalorder %s675_s5, %s484_s17  ;;  %p486_p13 = pneg %p681_p10 }
  0x17   : > { %s489_s21 = scalar_lea.hbm %s770_s0, 2048  ;;  %p490_p2 = scmp.lt.u32.totalorder %s675_s5, %s770_s0 }
  0x18   : > { %p487_p0 = pnand %p486_p13, %p485_p12  ;;  %p491_p3 = scmp.lt.u32.totalorder %s489_s21, %s484_s17 }
  0x19   : > { %p493_p5 = scmp.lt.u32.totalorder %s484_s17, %s675_s5 }
  0x1a   : > { %p488_p1 = pneg %p487_p0  ;;  %p492_p4 = por %p491_p3, %p490_p2 }
  0x1c   : > { %p494_p6 = por %p493_p5, %p492_p4 }
  0x1e   : > { %p495_p8 = pnand %p494_p6, %p488_p1 }
  0x20   : > { %498 = shalt.err (!%p495_p8)
}
  0x21   : > { %s499_s23 = scalar_lea.vmem %s670_s30, 256  ;;  %s582_s25 = smov [#allocation3]  }
  0x22   : > { %p500_p9 = scmp.ne.s32.totalorder %s670_s30, %s499_s23  ;;  %s504_s27 = sshll.u32 %s582_s25, 4  ;;  %s505_s27 = int_to_ptr.vmem [resolvable:$false] %s504_s27 }
  0x23   : > { %s506_s28 = scalar_lea.vmem %s505_s27, 512  ;;  %p507_p11 = scmp.lt.s32.totalorder %s670_s30, %s505_s27 }
  0x24   : > { %p502_p12 = pnand %p500_p9, %p486_p13  ;;  %p508_p2 = scmp.lt.s32.totalorder %s506_s28, %s499_s23 }
  0x26   : > { %p503_p0 = pneg %p502_p12  ;;  %p509_p3 = por %p508_p2, %p507_p11 }
  0x28   : > { %p510_p4 = pnand %p509_p3, %p503_p0 }
  0x2a   : > { %513 = shalt.err (!%p510_p4)
}
  0x2b   : > { %s583_s29 = smov 128   ;;  %s584_s2 = smov 8  }
  0x2c   : > { %411 = dma.hbm_to_vmem [thread:$0]  (!%p681_p10), %s675_s5, 256, %s670_s30, %s686_s14, %s583_s29, %s583_s29, %s584_s2  }
  0x2d   : > { %p121_p13 = scmp.lt.s32.totalorder %s580_s13, 7  ;;  %p775_p1 = scmp.ge.s32.totalorder %s580_s13, 1 }
  0x2f   : > { %p122_p5 = pnand %p775_p1, %p121_p13 }
  0x30   : > { %s127_s3 = sand.u32 (!%p122_p5), 1, %s556_s7  }
  0x31   : > { %125 = sbr.rel (%p122_p5) target bundleno = 342 (0x156), region = 24  ;;  %s400_s4 = sshll.u32 (!%p122_p5), %s127_s3, 4 }
  0x32   : > { %s128_s17 = scalar_lea.sflag (!%p122_p5), [#allocation4], %s127_s3  ;;  %s131_s18 = scalar_lea.vmem (!%p122_p5), [#allocation3], %s400_s4 }
  0x38   : > { %547 = dma.done.wait (%p657_p7), %s128_s17, 256  }
  0x39   : > { %549 = vsyncadd (%p657_p7), %s128_s17, 4294967040  ;;  %vm165_vm0 = vcmask 15360   ;;  %vm169_vm1 = vcmask 1047696   ;;  %v585_v0 = vmov 0.0   ;;  %v173_v1 = vld [vmem:[%s131_s18] sm:$0xff]  ;;  %s586_s30 = smov 2   ;;  %v240_v19 = vlaneseq }
  0x3a   : > { %163 = vst [vmem:[#allocation2] sm:$0x3] %v585_v0  ;;  %167 = vst.msk [vmem:[#allocation2 + $0x8] sm:$0xff] %vm165_vm0, %v585_v0  ;;  %177 = vrot.lane.b32.xlu0 %v173_v1, %s586_s30  ;;  %v174_v2 = vld [vmem:[%s131_s18 + $0x8] sm:$0xff]  ;;  %vm183_vm2 = vcmask 146448   ;;  %s587_s20 = smov 1  }
  0x3b   : > { %164 = vst [vmem:[#allocation2 + $0x12] sm:$0x3f] %v585_v0  ;;  %166 = vst.msk [vmem:[#allocation2] sm:$0xff] %vm165_vm0, %v585_v0  ;;  %s588_s5 = smov 127   ;;  %s589_s6 = smov 126   ;;  %v241_v29 = vshrl.u32 %v240_v19, 7 }
  0x3c   : > { %171 = vst.msk [vmem:[#allocation2 + $0x8] sm:$0xff] %vm169_vm1, %v585_v0  ;;  %170 = vst.msk [vmem:[#allocation2] sm:$0xff] %vm169_vm1, %v585_v0  ;;  %p154_p7 = scmp.lt.s32.totalorder %s568_s10, 1  ;;  %p156_p10 = scmp.lt.s32.totalorder %s564_s9, 2  ;;  %vm285_vm7 = vcmask 162816   ;;  %vm288_vm8 = vcmask 158720  }
  0x3d   : > { %168 = vst.msk [vmem:[#allocation2 + $0x10] sm:$0xff] %vm165_vm0, %v585_v0  ;;  %vm242_vm3 = vcmp.lt.s32.totalorder %v241_v29, 1  ;;  %vm249_vm4 = vcmp.lt.s32.totalorder %v241_v29, 7  ;;  %vm265_vm5 = vcmp.lt.s32.totalorder %v241_v29, 2  ;;  %vm272_vm6 = vcmp.lt.s32.totalorder %v241_v29, 6 }
  0x3e   : > { %172 = vst.msk [vmem:[#allocation2 + $0x10] sm:$0xff] %vm169_vm1, %v585_v0  ;;  %179 = vrot.lane.b32.xlu0 %v174_v2, %s586_s30  ;;  %s790_s10 = smov (!%p154_p7, %s568_s10), 1  ;;  %s792_s9 = smov (!%p156_p10, %s564_s9), 2 }
  0x3f   : > { %s405_s14 = smul.u32 9, %s790_s10 }
  0x40   : > { %s404_s19 = smul.u32 3, %s792_s9 }
  0x42   : > { %s160_s21 = sadd.s32 %s405_s14, %s404_s19 }
  0x43   : > { %s401_s9 = sshll.u32 %s160_s21, 3 }
  0x44   : > { %s162_s24 = scalar_lea.vmem %s771_s1, %s401_s9 }
  0xac   : > { %v178_v3 = vpop.permute.xlu0 %177 }
  0xad   : > { %184 = vst.msk [vmem:[#allocation2 + $0x2] sm:$0xff] %vm183_vm2, %v178_v3 }
  0xb0   : > { %v180_v4 = vpop.permute.xlu0 %179 }
  0xb1   : > { %185 = vst.msk [vmem:[#allocation2 + $0xa] sm:$0xff] %vm183_vm2, %v180_v4 }
  0xb4   : > { %v186_v5 = vld [vmem:[#allocation2] sm:$0xff] }
  0xb5   : > { %192 = vrot.lane.b32.xlu1 %v186_v5, %s587_s20  ;;  %v189_v22 = vmul.f32 0.40261996, %v186_v5 }
  0xb8   : > { %v188_v6 = vld [vmem:[#allocation2 + $0x10] sm:$0xff]  ;;  %v187_v7 = vld [vmem:[#allocation2 + $0x8] sm:$0xff] }
  0xb9   : > { %196 = vrot.lane.b32.xlu0 %v188_v6, %s587_s20  ;;  %194 = vrot.lane.b32.xlu1 %v187_v7, %s587_s20  ;;  %v190_v25 = vmul.f32 0.40261996, %v187_v7  ;;  %v191_v39 = vmul.f32 0.40261996, %v188_v6 }
  0xbd   : > { %200 = vrot.lane.b32.xlu0 %v187_v7, %s588_s5  ;;  %198 = vrot.lane.b32.xlu1 %v186_v5, %s588_s5 }
  0xc1   : > { %213 = vrot.lane.b32.xlu0 %v186_v5, %s586_s30  ;;  %202 = vrot.lane.b32.xlu1 %v188_v6, %s588_s5 }
  0xc5   : > { %217 = vrot.lane.b32.xlu0 %v188_v6, %s586_s30  ;;  %215 = vrot.lane.b32.xlu1 %v187_v7, %s586_s30 }
  0xc9   : > { %221 = vrot.lane.b32.xlu0 %v187_v7, %s589_s6  ;;  %219 = vrot.lane.b32.xlu1 %v186_v5, %s589_s6 }
  0xcd   : > { %223 = vrot.lane.b32.xlu1 %v188_v6, %s589_s6 }
 0x127   : > { %v193_v8 = vpop.permute.xlu1 %192 }
 0x12b   : > { %v197_v9 = vpop.permute.xlu0 %196  ;;  %v195_v10 = vpop.permute.xlu1 %194 }
 0x12f   : > { %v201_v11 = vpop.permute.xlu0 %200  ;;  %v199_v12 = vpop.permute.xlu1 %198 }
 0x130   : > { %v205_v15 = vadd.f32 %v201_v11, %v195_v10  ;;  %v204_v16 = vadd.f32 %v199_v12, %v193_v8 }
 0x132   : > { %v208_v20 = vmul.f32 0.24420135, %v205_v15  ;;  %v207_v21 = vmul.f32 0.24420135, %v204_v16 }
 0x133   : > { %v214_v13 = vpop.permute.xlu0 %213  ;;  %v203_v14 = vpop.permute.xlu1 %202 }
 0x134   : > { %v206_v26 = vadd.f32 %v203_v14, %v197_v9  ;;  %v211_v30 = vadd.f32 %v208_v20, %v190_v25  ;;  %v210_v31 = vadd.f32 %v207_v21, %v189_v22 }
 0x136   : > { %v209_v35 = vmul.f32 0.24420135, %v206_v26 }
 0x137   : > { %v218_v17 = vpop.permute.xlu0 %217  ;;  %v216_v18 = vpop.permute.xlu1 %215 }
 0x138   : > { %v212_v46 = vadd.f32 %v209_v35, %v191_v39 }
 0x13b   : > { %v222_v23 = vpop.permute.xlu0 %221  ;;  %v220_v24 = vpop.permute.xlu1 %219 }
 0x13c   : > { %v226_v27 = vadd.f32 %v222_v23, %v216_v18  ;;  %v225_v28 = vadd.f32 %v220_v24, %v214_v13 }
 0x13e   : > { %v229_v32 = vmul.f32 0.054488685, %v226_v27  ;;  %v228_v33 = vmul.f32 0.054488685, %v225_v28 }
 0x13f   : > { %v224_v34 = vpop.permute.xlu1 %223 }
 0x140   : > { %v232_v36 = vadd.f32 %v229_v32, %v211_v30  ;;  %v231_v37 = vadd.f32 %v228_v33, %v210_v31  ;;  %v227_v38 = vadd.f32 %v224_v34, %v218_v17 }
 0x142   : > { %v238_v40 = vrot.slane %v232_v36, 7  ;;  %v247_v41 = vrot.slane %v232_v36, 1  ;;  %v263_v42 = vrot.slane %v232_v36, 6  ;;  %v270_v43 = vrot.slane %v232_v36, 2 }
 0x143   : > { %v237_v44 = vrot.slane %v231_v37, 7  ;;  %v246_v45 = vrot.slane %v231_v37, 1  ;;  %v262_v47 = vrot.slane %v231_v37, 6  ;;  %v269_v48 = vrot.slane %v231_v37, 2 }
 0x144   : > { %v230_v49 = vmul.f32 0.054488685, %v227_v38  ;;  %v235_v58 = vmul.f32 0.40261996, %v232_v36  ;;  %v234_v59 = vmul.f32 0.40261996, %v231_v37 }
 0x145   : > { %v244_v50 = vsel %vm242_vm3, %v237_v44, %v238_v40  ;;  %v251_v51 = vsel %vm249_vm4, %v246_v45, %v247_v41  ;;  %v267_v52 = vsel %vm265_vm5, %v262_v47, %v263_v42  ;;  %v274_v53 = vsel %vm272_vm6, %v269_v48, %v270_v43 }
 0x146   : > { %v233_v54 = vadd.f32 %v230_v49, %v212_v46 }
 0x148   : > { %v239_v55 = vrot.slane %v233_v54, 7  ;;  %v248_v56 = vrot.slane %v233_v54, 1  ;;  %v264_v57 = vrot.slane %v233_v54, 6  ;;  %v271_v60 = vrot.slane %v233_v54, 2 }
 0x149   : > { %v236_v5 = vmul.f32 0.40261996, %v233_v54 }
 0x14a   : > { %v243_v61 = vsel %vm242_vm3, %v238_v40, %v239_v55  ;;  %v245_v62 = vsel %vm242_vm3, %v239_v55, %v237_v44  ;;  %v250_v63 = vsel %vm249_vm4, %v247_v41, %v248_v56  ;;  %v252_v0 = vsel %vm249_vm4, %v248_v56, %v246_v45 }
 0x14b   : > { %v253_v1 = vadd.f32 %v251_v51, %v245_v62  ;;  %v254_v2 = vadd.f32 %v250_v63, %v244_v50  ;;  %v255_v3 = vadd.f32 %v252_v0, %v243_v61  ;;  %v266_v4 = vsel %vm265_vm5, %v263_v42, %v264_v57 }
 0x14c   : > { %v268_v6 = vsel %vm265_vm5, %v264_v57, %v262_v47  ;;  %v273_v7 = vsel %vm272_vm6, %v270_v43, %v271_v60  ;;  %v275_v8 = vsel %vm272_vm6, %v271_v60, %v269_v48 }
 0x14d   : > { %v256_v9 = vmul.f32 0.24420135, %v253_v1  ;;  %v257_v10 = vmul.f32 0.24420135, %v254_v2  ;;  %v258_v11 = vmul.f32 0.24420135, %v255_v3  ;;  %v276_v12 = vadd.f32 %v274_v53, %v268_v6 }
 0x14e   : > { %v277_v13 = vadd.f32 %v273_v7, %v267_v52  ;;  %v278_v14 = vadd.f32 %v275_v8, %v266_v4 }
 0x14f   : > { %v259_v15 = vadd.f32 %v256_v9, %v234_v59  ;;  %v260_v16 = vadd.f32 %v257_v10, %v235_v58  ;;  %v261_v17 = vadd.f32 %v258_v11, %v236_v5  ;;  %v279_v18 = vmul.f32 0.054488685, %v276_v12 }
 0x150   : > { %v280_v19 = vmul.f32 0.054488685, %v277_v13  ;;  %v281_v20 = vmul.f32 0.054488685, %v278_v14 }
 0x151   : > { %v282_v21 = vadd.f32 %v279_v18, %v259_v15 }
 0x152   : > { %v283_v22 = vadd.f32 %v280_v19, %v260_v16  ;;  %v284_v23 = vadd.f32 %v281_v20, %v261_v17 }
 0x153   : > { %286 = vst.msk [vmem:[%s162_s24] sm:$0xff] %vm285_vm7, %v282_v21 }
 0x154   : > { %287 = vst.msk [vmem:[%s162_s24 + $0x8] sm:$0xff] %vm285_vm7, %v283_v22 }
 0x155   : > { %289 = vst.msk [vmem:[%s162_s24 + $0x10] sm:$0xf] %vm288_vm8, %v284_v23 }
 0x156 PF: > { %s14_s13 = sadd.s32 1, %s580_s13   ;;  %s776_s6 = smov %s556_s7 }
 0x157   : > { %p11_p11 = scmp.ge.s32.totalorder %s14_s13, 8   ;;  %s777_s7 = smov %s560_s8 }
 0x158   : > { %s778_s8 = smov %s667_s26  ;;  %s779_s9 = smov %s572_s11 }
 0x159   : > { %s780_s10 = smov %s576_s12  ;;  %s781_s11 = smov %s784_s15 }
 0x15a   : > { %s782_s12 = smov %s788_s16  ;;  %13 = sbr.rel (!%p11_p11) target bundleno = 5 (0x5), region = 64 }
 0x161   :  { %319 = vsyncpa [#allocation4], 1 }
 0x162   :  { %321 = vsyncpa [#allocation4 + $0x1], 1 }

</bundles_post_ra>
